<compile_context>
chip_gen: v7x
topology: tpu7x:2x2x1
jax: 0.10.0
libtpu: 0.0.40
codegen_flags: <defaults>
</compile_context>

<pallas_src>
import jax
import jax.numpy as jnp
from jax.experimental import pallas as pl
from jax.experimental.pallas import tpu as pltpu

LANES = 128
# <=512 rows (64K elements, <=256 KiB f32/operand): single un-pipelined block.
MAX_SINGLE_ROWS = 512
# Streamed-path row tile: (2048,128) f32 = 1 MiB/input/tile. 2 inputs x 2 pipeline
# buffers = 4 MiB VMEM (bf16: 2 MiB) -> well inside scoped-VMEM defaults on
# v5e/v6e (32/128 MiB) and v7x (32/64 MiB).
BIG_ROW_TILE = 2048
# Leading "parallel" grid axis so v7x's 2 TensorCores each reduce half the tiles.
NUM_SHARDS = 2


def _cdiv(a, b):
    return -(-a // b)


def _round_up(x, m):
    return _cdiv(x, m) * m


def _sigmoid_f32(x):
    # tanh form: one EUP push per element (vs exp + reciprocal).
    return 0.5 * jnp.tanh(0.5 * x) + 0.5


def _row_lane_mask(rows, row0, full_rows, tail):
    """(rows, LANES) bool validity mask. Row-based math (int32-safe)."""
    grow = row0 + jax.lax.broadcasted_iota(jnp.int32, (rows, LANES), 0)
    if tail:
        lane = jax.lax.broadcasted_iota(jnp.int32, (rows, LANES), 1)
        return (grow < full_rows) | ((grow == full_rows) & (lane < tail))
    return grow < full_rows


def _make_single_kernel(total, padded_rows, eps):
    """Whole reduction in one grid step (small inputs)."""
    full_rows, tail = divmod(total, LANES)
    needs_mask = padded_rows * LANES != total

    def kernel(pr_ref, gt_ref, loss_ref):
        pr = _sigmoid_f32(pr_ref[...].astype(jnp.float32))
        gt = gt_ref[...].astype(jnp.float32)
        tp_t = gt * pr
        sm_t = pr + gt  # sum(pr) + sum(gt) fused into one reduce
        if needs_mask:  # static decision at trace time
            valid = _row_lane_mask(padded_rows, 0, full_rows, tail)
            tp_t = jnp.where(valid, tp_t, 0.0)
            sm_t = jnp.where(valid, sm_t, 0.0)
        tp = jnp.sum(tp_t)
        s = jnp.sum(sm_t)
        eps_f = jnp.float32(eps)
        loss_ref[0, 0] = jnp.float32(1.0) - (2.0 * tp + eps_f) / (s + eps_f)

    return kernel


def _make_tiled_kernel(total, rows, row_tile, tiles, tiles_per_shard, num_shards):
    """Streamed reduction; per-shard (tp, sum) partials written to SMEM output."""
    full_rows, tail = divmod(total, LANES)
    last_partial = (tail > 0) or (rows % row_tile != 0)
    first_masked = tiles - 1 if last_partial else tiles   # first tile needing a mask
    padded_tiles = num_shards * tiles_per_shard
    any_mask = first_masked < padded_tiles                 # static
    groups = row_tile // 8

    def kernel(pr_ref, gt_ref, out_ref, tp_acc, sum_acc):
        s = pl.program_id(0)
        j = pl.program_id(1)
        g = s * tiles_per_shard + j  # global tile index (may be a pad tile)

        @pl.when(j == 0)
        def _init():
            tp_acc[...] = jnp.zeros_like(tp_acc)
            sum_acc[...] = jnp.zeros_like(sum_acc)

        def accumulate(masked):
            pr = _sigmoid_f32(pr_ref[...].astype(jnp.float32))
            gt = gt_ref[...].astype(jnp.float32)
            tp_t = gt * pr
            sm_t = pr + gt
            if masked:
                # Select (not multiply) so garbage in the partial edge block / pad
                # tiles can never leak into the sums.
                valid = _row_lane_mask(row_tile, g * row_tile, full_rows, tail)
                tp_t = jnp.where(valid, tp_t, 0.0)
                sm_t = jnp.where(valid, sm_t, 0.0)
            # Reduce the tile to one vreg with pure VALU strided adds, then
            # accumulate -> accumulator VMEM traffic is ~8 KiB/step.
            tp_acc[...] += tp_t.reshape(groups, 8, LANES).sum(axis=0)
            sum_acc[...] += sm_t.reshape(groups, 8, LANES).sum(axis=0)

        if any_mask:
            @pl.when(g < first_masked)
            def _fast():
                accumulate(masked=False)

            @pl.when(g >= first_masked)
            def _tail():
                accumulate(masked=True)
        else:
            accumulate(masked=False)

        @pl.when(j == tiles_per_shard - 1)
        def _finalize():
            out_ref[0, 0] = jnp.sum(tp_acc[...])
            out_ref[0, 1] = jnp.sum(sum_acc[...])

    return kernel


def _as_kernel_dtype(x):
    """Stream f32/bf16/f16 natively (halves HBM traffic for bf16); else cast to f32."""
    if x.dtype in (jnp.float32, jnp.bfloat16, jnp.float16):
        return x
    return x.astype(jnp.float32)


def _to_slab(x, rows):
    """Flatten to a lane-dense (rows, 128) slab in the input's dtype.

    The reshape of a contiguous flat array is free; a pad copy only happens when
    rows*128 != x.size (i.e. lane-alignment of the tail, or small-path padding).
    """
    flat = jnp.ravel(x)
    need = rows * LANES
    if need != flat.shape[0]:
        flat = jnp.pad(flat, (0, need - flat.shape[0]))
    return flat.reshape(rows, LANES)


def _pick_row_tile(rows):
    if rows >= 4 * BIG_ROW_TILE:
        return BIG_ROW_TILE
    # Mid-size inputs: aim for ~4 grid steps so DMA overlaps compute.
    # Multiple of 32 keeps the block sublane-aligned for f32/bf16/f16/int8 tilings.
    return min(BIG_ROW_TILE, max(64, _round_up(_cdiv(rows, 4), 32)))


def dice_loss(y_pr, y_gt, eps=1e-07):
    assert y_pr.shape == y_gt.shape
    total = int(y_pr.size)
    eps = float(eps)

    pr = _as_kernel_dtype(y_pr)
    gt = _as_kernel_dtype(y_gt)

    full_rows, tail = divmod(total, LANES)
    rows = full_rows + (1 if tail else 0)

    if rows <= MAX_SINGLE_ROWS:
        # ---------------- single-block path (tiny inputs) ----------------
        padded_rows = _round_up(max(rows, 8), 32)
        pr2d = _to_slab(pr, padded_rows)
        gt2d = _to_slab(gt, padded_rows)

        loss = pl.pallas_call(
            _make_single_kernel(total, padded_rows, eps),
            out_shape=jax.ShapeDtypeStruct((1, 1), jnp.float32),
            grid=(1,),
            in_specs=[
                pl.BlockSpec((padded_rows, LANES), lambda i: (0, 0)),
                pl.BlockSpec((padded_rows, LANES), lambda i: (0, 0)),
            ],
            out_specs=pl.BlockSpec((1, 1), lambda i: (0, 0),
                                   memory_space=pltpu.SMEM),
            compiler_params=pltpu.CompilerParams(
                dimension_semantics=("arbitrary",)),
        )(pr2d, gt2d)
        return loss[0, 0]

    # ---------------- streamed path (pipelined, 2-TC capable) ----------------
    row_tile = _pick_row_tile(rows)
    tiles = _cdiv(rows, row_tile)
    num_shards = NUM_SHARDS if tiles >= 2 else 1
    tps = _cdiv(tiles, num_shards)

    pr2d = _to_slab(pr, rows)   # pad copy only if total % 128 != 0
    gt2d = _to_slab(gt, rows)

    def in_map(s, j):
        # Clamp so shard-padding tiles never DMA out of bounds; they are fully
        # masked inside the kernel (their global index is >= tiles).
        return (jnp.minimum(s * tps + j, tiles - 1), 0)

    partials = pl.pallas_call(
        _make_tiled_kernel(total, rows, row_tile, tiles, tps, num_shards),
        out_shape=jax.ShapeDtypeStruct((num_shards, 2), jnp.float32),
        grid_spec=pltpu.PrefetchScalarGridSpec(
            num_scalar_prefetch=0,
            grid=(num_shards, tps),
            in_specs=[
                pl.BlockSpec((row_tile, LANES), in_map),
                pl.BlockSpec((row_tile, LANES), in_map),
            ],
            out_specs=pl.BlockSpec((1, 2), lambda s, j: (s, 0),
                                   memory_space=pltpu.SMEM),
            scratch_shapes=[
                pltpu.VMEM((8, LANES), jnp.float32),   # tp accumulator (one vreg)
                pltpu.VMEM((8, LANES), jnp.float32),   # pr+gt accumulator (one vreg)
            ],
        ),
        compiler_params=pltpu.CompilerParams(
            dimension_semantics=("parallel", "arbitrary")),
    )(pr2d, gt2d)

    tp = jnp.sum(partials[:, 0])
    denom = jnp.sum(partials[:, 1])
    eps_f = jnp.float32(eps)
    return jnp.float32(1.0) - (2.0 * tp + eps_f) / (denom + eps_f)


def dice_loss_ref(y_pr, y_gt, eps=1e-07):
    pr = jax.nn.sigmoid(y_pr.astype(jnp.float32))
    gt = y_gt.astype(jnp.float32)
    tp = jnp.sum(gt * pr)
    fp = jnp.sum(pr) - tp
    fn = jnp.sum(gt) - tp
    score = (2.0 * tp + eps) / (2.0 * tp + fn + fp + eps)
    return 1.0 - score


if __name__ == "__main__":
    key = jax.random.PRNGKey(0)
    k1, k2, k3, k4, k5, k6 = jax.random.split(key, 6)

    # NCHW like the PyTorch segmentation setup: batch=2, channels=4, spatial=16.
    y_pr = jax.random.normal(k1, (2, 4, 16, 16), dtype=jnp.float32)  # logits
    y_gt = (jax.random.uniform(k2, (2, 4, 16, 16)) > 0.5).astype(jnp.float32)
    out = jax.block_until_ready(dice_loss(y_pr, y_gt))
    ref = dice_loss_ref(y_pr, y_gt)
    assert jnp.allclose(out, ref, atol=1e-5, rtol=1e-5), (out, ref)

    # Odd-sized input exercising the in-kernel tail mask on the single-block path.
    y_pr2 = jax.random.normal(k3, (2, 3, 7, 9), dtype=jnp.float32)
    y_gt2 = (jax.random.uniform(k4, (2, 3, 7, 9)) > 0.5).astype(jnp.float32)
    out2 = jax.block_until_ready(dice_loss(y_pr2, y_gt2))
    ref2 = dice_loss_ref(y_pr2, y_gt2)
    assert jnp.allclose(out2, ref2, atol=1e-5, rtol=1e-5), (out2, ref2)

    # Larger input exercising the streamed (sharded, pipelined) path with a ragged
    # last tile and a mixed-dtype (bf16 logits) stream.
    y_pr3 = jax.random.normal(k5, (2, 4, 100, 100), dtype=jnp.float32).astype(jnp.bfloat16)
    y_gt3 = (jax.random.uniform(k6, (2, 4, 100, 100)) > 0.5).astype(jnp.float32)
    out3 = jax.block_until_ready(dice_loss(y_pr3, y_gt3))
    ref3 = dice_loss_ref(y_pr3, y_gt3)
    assert jnp.allclose(out3, ref3, atol=1e-5, rtol=1e-5), (out3, ref3)

    print("KERNEL_OK")
</pallas_src>

<mosaic_0001>
module attributes {stable_mosaic.version = 11 : i64} {
  func.func @kernel(%arg0: i32, %arg1: memref<32x128xf32, #tpu.memory_space<vmem>>, %arg2: memref<32x128xf32, #tpu.memory_space<vmem>>, %arg3: memref<1x1xf32, #tpu.memory_space<smem>>) attributes {dimension_semantics = [#tpu.dimension_semantics<arbitrary>], iteration_bounds = array<i64: 1>, scalar_prefetch = 0 : i64, scratch_operands = 0 : i64, tpu.core_type = #tpu.core_type<tc>, window_params = [{pipeline_mode = #tpu.pipeline_mode<synchronous>, transform_indices = @transform_0, window_bounds = array<i64: 32, 128>}, {pipeline_mode = #tpu.pipeline_mode<synchronous>, transform_indices = @transform_1, window_bounds = array<i64: 32, 128>}, {transform_indices = @transform_2, window_bounds = array<i64: 1, 1>}]} {
    %c0 = arith.constant 0 : index
    %c0_0 = arith.constant 0 : index
    %0 = vector.load %arg1[%c0, %c0_0] : memref<32x128xf32, #tpu.memory_space<vmem>>, vector<32x128xf32>
    %cst = arith.constant 5.000000e-01 : f32
    %1 = vector.broadcast %cst : f32 to vector<32x128xf32>
    %2 = arith.mulf %1, %0 : vector<32x128xf32>
    %3 = math.tanh %2 : vector<32x128xf32>
    %cst_1 = arith.constant 5.000000e-01 : f32
    %4 = vector.broadcast %cst_1 : f32 to vector<32x128xf32>
    %5 = arith.mulf %4, %3 : vector<32x128xf32>
    %cst_2 = arith.constant 5.000000e-01 : f32
    %6 = vector.broadcast %cst_2 : f32 to vector<32x128xf32>
    %7 = arith.addf %5, %6 : vector<32x128xf32>
    %c0_3 = arith.constant 0 : index
    %c0_4 = arith.constant 0 : index
    %8 = vector.load %arg2[%c0_3, %c0_4] : memref<32x128xf32, #tpu.memory_space<vmem>>, vector<32x128xf32>
    %9 = arith.mulf %8, %7 : vector<32x128xf32>
    %10 = arith.addf %7, %8 : vector<32x128xf32>
    %11 = tpu.iota {dimensions = array<i32: 0>} : vector<32x128xi32>
    %c0_i32 = arith.constant 0 : i32
    %12 = vector.broadcast %c0_i32 : i32 to vector<32x128xi32>
    %13 = arith.addi %12, %11 : vector<32x128xi32>
    %c16_i32 = arith.constant 16 : i32
    %14 = vector.broadcast %c16_i32 : i32 to vector<32x128xi32>
    %15 = arith.cmpi slt, %13, %14 : vector<32x128xi32>
    %cst_5 = arith.constant 0.000000e+00 : f32
    %16 = vector.broadcast %cst_5 : f32 to vector<32x128xf32>
    %17 = arith.select %15, %9, %16 : vector<32x128xi1>, vector<32x128xf32>
    %cst_6 = arith.constant 0.000000e+00 : f32
    %18 = vector.broadcast %cst_6 : f32 to vector<32x128xf32>
    %19 = arith.select %15, %10, %18 : vector<32x128xi1>, vector<32x128xf32>
    %20 = vector.shape_cast %17 : vector<32x128xf32> to vector<1x32x128xf32>
    %cst_7 = arith.constant dense<0.000000e+00> : vector<1xf32>
    %21 = vector.multi_reduction <add>, %20, %cst_7 [1, 2] : vector<1x32x128xf32> to vector<1xf32>
    %22 = vector.shape_cast %21 : vector<1xf32> to vector<1x1x1xf32>
    %23 = vector.extract %22[0, 0, 0] : f32 from vector<1x1x1xf32>
    %24 = vector.shape_cast %19 : vector<32x128xf32> to vector<1x32x128xf32>
    %cst_8 = arith.constant dense<0.000000e+00> : vector<1xf32>
    %25 = vector.multi_reduction <add>, %24, %cst_8 [1, 2] : vector<1x32x128xf32> to vector<1xf32>
    %26 = vector.shape_cast %25 : vector<1xf32> to vector<1x1x1xf32>
    %27 = vector.extract %26[0, 0, 0] : f32 from vector<1x1x1xf32>
    %cst_9 = arith.constant 2.000000e+00 : f32
    %28 = arith.mulf %cst_9, %23 : f32
    %cst_10 = arith.constant 1.000000e-07 : f32
    %29 = arith.addf %28, %cst_10 : f32
    %cst_11 = arith.constant 1.000000e-07 : f32
    %30 = arith.addf %27, %cst_11 : f32
    %31 = arith.divf %29, %30 : f32
    %cst_12 = arith.constant 1.000000e+00 : f32
    %32 = arith.subf %cst_12, %31 : f32
    %c0_13 = arith.constant 0 : index
    %c0_14 = arith.constant 0 : index
    %33 = memref.load %arg3[%c0_13, %c0_14] : memref<1x1xf32, #tpu.memory_space<smem>>
    memref.store %32, %arg3[%c0_13, %c0_14] : memref<1x1xf32, #tpu.memory_space<smem>>
    return
  }
  func.func @transform_0(%arg0: i32) -> (i32, i32) {
    %c0_i32 = arith.constant 0 : i32
    %c0_i32_0 = arith.constant 0 : i32
    %c0_i32_1 = arith.constant 0 : i32
    return %c0_i32, %c0_i32_0 : i32, i32
  }
  func.func @transform_1(%arg0: i32) -> (i32, i32) {
    %c0_i32 = arith.constant 0 : i32
    %c0_i32_0 = arith.constant 0 : i32
    %c0_i32_1 = arith.constant 0 : i32
    return %c0_i32, %c0_i32_0 : i32, i32
  }
  func.func @transform_2(%arg0: i32) -> (i32, i32) {
    %c0_i32 = arith.constant 0 : i32
    %c0_i32_0 = arith.constant 0 : i32
    %c0_i32_1 = arith.constant 0 : i32
    return %c0_i32, %c0_i32_0 : i32, i32
  }
}

</mosaic_0001>

<bundles_post_ra>
// kernel: tpu_custom_call.1
= control target key start
LH: loop header
LB: loop body
LE: loop exit
PB: predicated region body
PF: predicated region fallthrough
CT: control target
= control target key end

     0   :  { %7 = vsyncpa [#allocation3], 0  ;;  %s271_s0 = inlined_call_operand.hbm [shape: f32[32,128], index: 0, kind: input, shape index: {}]   ;;  %s272_s1 = inlined_call_operand.hbm [shape: f32[32,128], index: 1, kind: input, shape index: {}]   ;;  %s273_s2 = inlined_call_operand.hbm [shape: f32[1,1], index: 2, kind: output, shape index: {}]  }
   0x1   :  { %8 = vsyncpa [#allocation6], 0 }
   0x2   :  { %9 = vsyncpa [#allocation4], 0  ;;  %s215_s9 = smov [#allocation2]   ;;  %s155_s13 = scalar_lea.hbm %s271_s0, 512 }
   0x3   :  { %s15_s10 = sshll.u32 %s215_s9, 4  ;;  %p156_p0 = scmp.ne.s32.totalorder %s271_s0, %s155_s13  ;;  %s16_s10 = int_to_ptr.vmem [resolvable:$true] %s15_s10 }
   0x4   :  { %p159_p1 = scmp.lt.u32.totalorder %s155_s13, %s271_s0 }
   0x6   :  { %p161_p2 = pnand %p159_p1, %p156_p0 }
   0x8   :  { %164 = shalt.err (!%p161_p2)
}
   0x9   :  { %s165_s18 = scalar_lea.vmem %s16_s10, 512  ;;  %p170_p4 = scmp.lt.s32.totalorder %s16_s10, %s16_s10 }
   0xa   :  { %p166_p3 = scmp.ne.s32.totalorder %s16_s10, %s165_s18  ;;  %p171_p5 = scmp.lt.s32.totalorder %s165_s18, %s165_s18 }
   0xc   :  { %p172_p6 = por %p171_p5, %p170_p4 }
   0xe   :  { %p173_p7 = pnand %p172_p6, %p166_p3 }
  0x10   :  { %176 = shalt.err (!%p173_p7)
}
  0x11   :  { %s216_s19 = smov 128   ;;  %s217_s20 = smov 8  }
  0x12   :  { %21 = dma.hbm_to_vmem [thread:$0]  %s271_s0, 512, %s16_s10, [#allocation3], %s216_s19, %s216_s19, %s217_s20  }
  0x13   :  { %s218_s23 = smov [#allocation5]   ;;  %s177_s27 = scalar_lea.hbm %s272_s1, 512 }
  0x14   :  { %s27_s24 = sshll.u32 %s218_s23, 4  ;;  %p178_p8 = scmp.ne.s32.totalorder %s272_s1, %s177_s27  ;;  %s28_s24 = int_to_ptr.vmem [resolvable:$true] %s27_s24 }
  0x15   :  { %p181_p9 = scmp.lt.u32.totalorder %s177_s27, %s272_s1 }
  0x17   :  { %p183_p10 = pnand %p181_p9, %p178_p8 }
  0x19   :  { %186 = shalt.err (!%p183_p10)
}
  0x1a   :  { %s187_s4 = scalar_lea.vmem %s28_s24, 512  ;;  %p192_p12 = scmp.lt.s32.totalorder %s28_s24, %s28_s24 }
  0x1b   :  { %p188_p11 = scmp.ne.s32.totalorder %s28_s24, %s187_s4  ;;  %p193_p13 = scmp.lt.s32.totalorder %s187_s4, %s187_s4 }
  0x1d   :  { %p194_p0 = por %p193_p13, %p192_p12 }
  0x1f   :  { %p195_p1 = pnand %p194_p0, %p188_p11 }
  0x21   :  { %198 = shalt.err (!%p195_p1)
}
  0x22   :  { %33 = dma.hbm_to_vmem [thread:$0]  %s272_s1, 512, %s28_s24, [#allocation6], %s216_s19, %s216_s19, %s217_s20  }
  0x23   :  { %209 = dma.done.wait [#allocation3], 512  }
  0x24   :  { %210 = vsyncadd [#allocation3], 4294966784 }
  0x25   :  { %211 = dma.done.wait [#allocation6], 512  }
  0x26   :  { %212 = vsyncadd [#allocation6], 4294966784  ;;  %v40_v0 = vld [vmem:[#allocation2] sm:$0xff]  ;;  %v41_v1 = vld [vmem:[#allocation2 + $0x8] sm:$0xff]  ;;  %s199_s15 = scalar_lea.hbm %s273_s2, 16 }
  0x27   :  { %v44_v2 = vmul.f32 0.5, %v40_v0  ;;  %v45_v3 = vmul.f32 0.5, %v41_v1  ;;  %v60_v8 = vld [vmem:[#allocation5] sm:$0xff]  ;;  %v61_v10 = vld [vmem:[#allocation5 + $0x8] sm:$0xff]  ;;  %p200_p2 = scmp.ne.s32.totalorder %s273_s2, %s199_s15  ;;  %p203_p3 = scmp.lt.u32.totalorder %s199_s15, %s273_s2 }
  0x29   :  { %149 = vtanh.f32 %v44_v2  ;;  %p205_p4 = pnand %p203_p3, %p200_p2 }
  0x2a   :  { %151 = vtanh.f32 %v45_v3 }
  0x33   :  { %v150_v4 = vpop.eup %149 }
  0x34   :  { %v152_v5 = vpop.eup %151  ;;  %v52_v6 = vmul.f32 0.5, %v150_v4 }
  0x35   :  { %v53_v7 = vmul.f32 0.5, %v152_v5 }
  0x36   :  { %v56_v9 = vadd.f32 0.5, %v52_v6 }
  0x37   :  { %v57_v11 = vadd.f32 0.5, %v53_v7 }
  0x38   :  { %v64_v12 = vmul.f32 %v60_v8, %v56_v9  ;;  %v68_v14 = vadd.f32 %v60_v8, %v56_v9 }
  0x39   :  { %v65_v13 = vmul.f32 %v61_v10, %v57_v11  ;;  %v69_v15 = vadd.f32 %v61_v10, %v57_v11 }
  0x3b   :  { %v89_v16 = vadd.f32 %v65_v13, %v64_v12  ;;  %v101_v17 = vadd.f32 %v69_v15, %v68_v14 }
  0x3d   :  { %92 = vadd.xlane.f32.xlu0 %v89_v16 }
  0x41   :  { %104 = vadd.xlane.f32.xlu0 %v101_v17 }
  0xca   :  { %v93_v18 = vpop.xlane.xlu0 %92 }
  0xcb   :  { %v94_v19 = vrot.slane %v93_v18, 4 }
  0xcd   :  { %v95_v20 = vadd.f32 %v94_v19, %v93_v18 }
  0xce   :  { %v105_v21 = vpop.xlane.xlu0 %104 }
  0xcf   :  { %v96_v22 = vrot.slane %v95_v20, 2  ;;  %v106_v23 = vrot.slane %v105_v21, 4 }
  0xd1   :  { %v107_v24 = vadd.f32 %v106_v23, %v105_v21  ;;  %v97_v25 = vadd.f32 %v96_v22, %v95_v20 }
  0xd3   :  { %v108_v26 = vrot.slane %v107_v24, 2  ;;  %v98_v27 = vrot.slane %v97_v25, 1 }
  0xd5   :  { %v109_v28 = vadd.f32 %v108_v26, %v107_v24  ;;  %v99_v29 = vadd.f32 %v98_v27, %v97_v25 }
  0xd7   :  { %138 = vpush %v99_v29  ;;  %v110_v30 = vrot.slane %v109_v28, 1 }
  0xd9   :  { %v111_v31 = vadd.f32 %v110_v30, %v109_v28 }
  0xdb   :  { %140 = vpush %v111_v31 }
 0x108   :  { %s139_s1 = spop %138 }
 0x109   :  { %s113_s8 = smul.f32 2.0, %s139_s1 }
 0x10b   :  { %s114_s9 = sadd.f32 1e-07, %s113_s8 }
 0x10c   :  { %s141_s6 = spop %140 }
 0x10d   :  { %s115_s7 = sadd.f32 1e-07, %s141_s6 }
 0x10f   :  { %v116_v32 = vstv %s115_s7 }
 0x110   :  { %153 = vrcp.f32 %v116_v32 }
 0x11a   :  { %v154_v33 = vpop.eup %153 }
 0x11b   :  { %142 = vpush %v154_v33 }
 0x14c   :  { %s143_s10 = spop %142 }
 0x14d   :  { %s119_s11 = smul.f32 %s143_s10, %s114_s9 }
 0x14f   :  { %s120_s12 = ssub.f32 1.0, %s119_s11 }
 0x151   :  { %122 = sst [smem:[#allocation7]] %s120_s12 }
 0x152   :  { %208 = shalt.err (!%p205_p4)
}
 0x153   :  { %s219_s20 = smov [#allocation7]  }
 0x154   :  { %130 = dma.smem_to_hbm %s219_s20, 16, %s273_s2, [#allocation4]  }
 0x155   :  { %213 = dma.done.wait [#allocation4], 16  }
 0x156   :  { %214 = vsyncadd [#allocation4], 4294967280 }
 0x157   :  { %134 = sfence }
 0x158   :  { %135 = vsyncpa [#allocation3], 1 }
 0x159   :  { %136 = vsyncpa [#allocation6], 1 }
 0x15a   :  { %137 = vsyncpa [#allocation4], 1 }

</bundles_post_ra>
